<compile_context>
chip_gen: v7x
topology: tpu7x:2x2x1
jax: 0.10.0
libtpu: 0.0.40
codegen_flags: <defaults>
</compile_context>

<pallas_src>
import functools

import jax
import jax.numpy as jnp
from jax import lax
from jax.experimental import pallas as pl
from jax.experimental.pallas import tpu as pltpu

_LANES = 128
_SUBLANES = 8


def _round_up(x, m):
    return ((x + m - 1) // m) * m


def _quantile_loss_kernel(p_ref, t_ref, o_ref, *, c_small, c_large, threshold,
                          block_rows, valid_rows, need_mask):
    # p_ref/t_ref: (block_rows, 128) in native dtype; o_ref: (8, 128) f32 partials.
    p = p_ref[...].astype(jnp.float32)
    t = t_ref[...].astype(jnp.float32)
    e = t - p
    ae = jnp.abs(e)
    # pinball(e, q) = q*relu(e) + (1-q)*relu(-e) == 0.5 * (|e| + (2q - 1) * e)
    # (|e| <= threshold uses q1, else q2 — same non-strict compare as PyTorch).
    c = jnp.where(ae <= jnp.float32(threshold),
                  jnp.float32(c_small), jnp.float32(c_large))
    v = ae + c * e                                     # == 2 * pinball(e, q)
    if need_mask:
        # Ragged last row-tile: rows >= valid_rows hold unspecified data.
        row = (pl.program_id(0) * block_rows
               + lax.broadcasted_iota(jnp.int32, v.shape, 0))
        v = jnp.where(row < valid_rows, v, 0.0)
    # (block_rows//8, 8, 128) splits exactly on vreg tile boundaries -> pure
    # VALU adds; the (8,128) output store stays dense / unmasked.
    o_ref[...] = v.reshape(block_rows // _SUBLANES, _SUBLANES, _LANES).sum(axis=0)


def custom_quantile_loss(preds, target, q1=0.06, q2=0.6, threshold=0.001,
                         block_rows=2048):
    """Pallas implementation of CustomQuantileLoss.forward(preds, target)."""
    assert preds.shape == target.shape
    n = preds.size
    if n == 0:
        # torch.cat([empty, empty]).mean() is NaN.
        return jnp.float32(jnp.nan)

    # Keep native dtype (bf16 halves HBM traffic); cast happens in-kernel.
    p = preds.reshape(-1)
    t = target.reshape(-1)

    rows = pl.cdiv(n, _LANES)
    padded_n = rows * _LANES
    if padded_n != n:
        # Minimal pad (< 128 zeros; error == 0 contributes exactly 0).
        # TODO(synk): could be fused away via CompilerParams(allow_input_fusion).
        p = jnp.pad(p, (0, padded_n - n))
        t = jnp.pad(t, (0, padded_n - n))
    p2d = p.reshape(rows, _LANES)
    t2d = t.reshape(rows, _LANES)

    # Rows per tile: big blocks amortize per-step overhead, clipped to problem.
    tm = min(_round_up(int(block_rows), _SUBLANES), _round_up(rows, _SUBLANES))
    # v7x megacore: ensure >= 2 row tiles whenever there is enough work.
    if pl.cdiv(rows, tm) < 2 and rows > _SUBLANES:
        tm = _round_up(pl.cdiv(rows, 2), _SUBLANES)
    tm = max(tm, _SUBLANES)
    num_tiles = pl.cdiv(rows, tm)
    need_mask = (rows % tm) != 0   # partial edge block -> mask in-kernel

    kernel = functools.partial(
        _quantile_loss_kernel,
        c_small=2.0 * float(q1) - 1.0,
        c_large=2.0 * float(q2) - 1.0,
        threshold=float(threshold),
        block_rows=tm,
        valid_rows=rows,
        need_mask=need_mask,
    )

    in_bytes = padded_n * (p2d.dtype.itemsize + t2d.dtype.itemsize)
    partials = pl.pallas_call(
        kernel,
        out_shape=jax.ShapeDtypeStruct((num_tiles * _SUBLANES, _LANES), jnp.float32),
        grid_spec=pltpu.PrefetchScalarGridSpec(
            num_scalar_prefetch=0,
            grid=(num_tiles,),
            in_specs=[
                pl.BlockSpec((tm, _LANES), lambda i: (i, 0)),
                pl.BlockSpec((tm, _LANES), lambda i: (i, 0)),
            ],
            out_specs=pl.BlockSpec((_SUBLANES, _LANES), lambda i: (i, 0)),
        ),
        compiler_params=pltpu.CompilerParams(
            dimension_semantics=("parallel",),      # shard row tiles across TCs (v7x)
            vmem_limit_bytes=32 * 1024 * 1024,      # explicit: v5e default is only 16 MiB
        ),
        cost_estimate=pl.CostEstimate(
            flops=7 * padded_n,
            transcendentals=0,
            bytes_accessed=in_bytes + num_tiles * _SUBLANES * _LANES * 4,
        ),
    )(p2d, t2d)

    # Tiny cross-tile / cross-lane finish.  0.5 from the algebraic rewrite is
    # folded into the scale; denominator is the original numel (the two masks
    # partition the tensor, so cat(...).mean() == sum(pinball)/numel).
    return jnp.sum(partials) * jnp.float32(0.5 / n)


def _reference(preds, target, q1, q2, threshold):
    # Mirrors the PyTorch masked cat + mean formulation.
    e = (target - preds).astype(jnp.float32).reshape(-1)
    ae = jnp.abs(e)
    relu = lambda z: jnp.maximum(z, 0.0)
    pin_small = q1 * relu(e) + (1.0 - q1) * relu(-e)
    pin_large = q2 * relu(e) + (1.0 - q2) * relu(-e)
    small = ae <= threshold
    return (jnp.sum(jnp.where(small, pin_small, 0.0))
            + jnp.sum(jnp.where(~small, pin_large, 0.0))) / e.size


if __name__ == "__main__":
    key = jax.random.PRNGKey(0)
    q1, q2, threshold = 0.06, 0.6, 0.001
    k1, k2, k3, k4 = jax.random.split(key, 4)

    # Case 1: mimics output_Y vs test_Y[250:500] -> 250 samples, 8 targets.
    # Mixed-scale noise so both |e| <= threshold and |e| > threshold fire.
    preds = jax.random.normal(k1, (250, 8), dtype=jnp.float32)
    target = preds + 0.002 * jax.random.normal(k2, (250, 8), dtype=jnp.float32)
    loss = custom_quantile_loss(preds, target, q1, q2, threshold)
    jax.block_until_ready(loss)
    ref = _reference(preds, target, q1, q2, threshold)
    assert loss.shape == ()
    assert jnp.allclose(loss, ref, rtol=1e-5, atol=1e-7), (loss, ref)

    # Case 2: odd shape exercising the minimal pad + in-kernel ragged-row mask.
    preds2 = jax.random.normal(k3, (7, 37), dtype=jnp.float32)
    target2 = preds2 + 0.002 * jax.random.normal(k4, (7, 37), dtype=jnp.float32)
    loss2 = custom_quantile_loss(preds2, target2, q1, q2, threshold)
    jax.block_until_ready(loss2)
    ref2 = _reference(preds2, target2, q1, q2, threshold)
    assert jnp.allclose(loss2, ref2, rtol=1e-5, atol=1e-7), (loss2, ref2)

    print("KERNEL_OK")
</pallas_src>

<mosaic_0001>
module attributes {stable_mosaic.version = 11 : i64} {
  func.func @_quantile_loss_kernel(%arg0: i32, %arg1: memref<8x128xf32, #tpu.memory_space<vmem>>, %arg2: memref<8x128xf32, #tpu.memory_space<vmem>>, %arg3: memref<8x128xf32, #tpu.memory_space<vmem>>) attributes {dimension_semantics = [#tpu.dimension_semantics<parallel>], iteration_bounds = array<i64: 2>, scalar_prefetch = 0 : i64, scratch_operands = 0 : i64, tpu.core_type = #tpu.core_type<tc>, window_params = [{transform_indices = @transform_0, window_bounds = array<i64: 8, 128>}, {transform_indices = @transform_1, window_bounds = array<i64: 8, 128>}, {transform_indices = @transform_2, window_bounds = array<i64: 8, 128>}]} {
    %c0 = arith.constant 0 : index
    %c0_0 = arith.constant 0 : index
    %0 = vector.load %arg1[%c0, %c0_0] : memref<8x128xf32, #tpu.memory_space<vmem>>, vector<8x128xf32>
    %c0_1 = arith.constant 0 : index
    %c0_2 = arith.constant 0 : index
    %1 = vector.load %arg2[%c0_1, %c0_2] : memref<8x128xf32, #tpu.memory_space<vmem>>, vector<8x128xf32>
    %2 = arith.subf %1, %0 : vector<8x128xf32>
    %3 = math.absf %2 : vector<8x128xf32>
    %cst = arith.constant 1.000000e-03 : f32
    %4 = vector.broadcast %cst : f32 to vector<8x128xf32>
    %5 = arith.cmpf ole, %3, %4 : vector<8x128xf32>
    %cst_3 = arith.constant -0.879999995 : f32
    %cst_4 = arith.constant 2.000000e-01 : f32
    %6 = vector.broadcast %cst_3 : f32 to vector<8x128xf32>
    %7 = vector.broadcast %cst_4 : f32 to vector<8x128xf32>
    %8 = arith.select %5, %6, %7 : vector<8x128xi1>, vector<8x128xf32>
    %9 = arith.mulf %8, %2 : vector<8x128xf32>
    %10 = arith.addf %3, %9 : vector<8x128xf32>
    %11 = vector.shape_cast %10 : vector<8x128xf32> to vector<1x8x128xf32>
    %cst_5 = arith.constant dense<0.000000e+00> : vector<8x128xf32>
    %12 = vector.multi_reduction <add>, %11, %cst_5 [0] : vector<1x8x128xf32> to vector<8x128xf32>
    %c0_6 = arith.constant 0 : index
    %c0_7 = arith.constant 0 : index
    %13 = vector.load %arg3[%c0_6, %c0_7] : memref<8x128xf32, #tpu.memory_space<vmem>>, vector<8x128xf32>
    tpu.vector_store %arg3[%c0_6, %c0_7], %12 {strides = array<i32>} : memref<8x128xf32, #tpu.memory_space<vmem>>, vector<8x128xf32>,
    return
  }
  func.func @transform_0(%arg0: i32) -> (i32, i32) {
    %c0_i32 = arith.constant 0 : i32
    %c0_i32_0 = arith.constant 0 : i32
    return %arg0, %c0_i32 : i32, i32
  }
  func.func @transform_1(%arg0: i32) -> (i32, i32) {
    %c0_i32 = arith.constant 0 : i32
    %c0_i32_0 = arith.constant 0 : i32
    return %arg0, %c0_i32 : i32, i32
  }
  func.func @transform_2(%arg0: i32) -> (i32, i32) {
    %c0_i32 = arith.constant 0 : i32
    %c0_i32_0 = arith.constant 0 : i32
    return %arg0, %c0_i32 : i32, i32
  }
}

</mosaic_0001>

<bundles_post_ra>
// kernel: tpu_custom_call.1
= control target key start
LH: loop header
LB: loop body
LE: loop exit
PB: predicated region body
PF: predicated region fallthrough
CT: control target
= control target key end

     0   :  { %7 = vsyncpa [#allocation3], 0  ;;  %s740_s0 = inlined_call_operand.hbm [shape: f32[16,128], index: 0, kind: input, shape index: {}]   ;;  %s741_s1 = inlined_call_operand.hbm [shape: f32[16,128], index: 1, kind: input, shape index: {}]   ;;  %s742_s2 = inlined_call_operand.hbm [shape: f32[16,128], index: 2, kind: output, shape index: {}]  }
   0x1   :  { %9 = vsyncpa [#allocation3 + $0x1], 0 }
   0x2   :  { %10 = vsyncpa [#allocation6], 0 }
   0x3   :  { %12 = vsyncpa [#allocation6 + $0x1], 0 }
   0x4   :  { %13 = vsyncpa [#allocation4], 0 }
   0x5   :  { %15 = vsyncpa [#allocation4 + $0x1], 0  ;;  %s531_s9 = smov 0   ;;  %s533_s10 = smov 0  }
   0x6   :  { %s535_s11 = smov 0   ;;  %s537_s12 = smov 0  }
   0x7 LB: > { %s552_s13 = sadd.s32 4294967295, %s510_s12   ;;  %s313_s14 = sadd.s32 4294967294, %s510_s12   ;;  %s510_s12 = sphi %s537_s12, %s761_s12   ;;  %s506_s11 = sphi %s535_s11, %s760_s11   ;;  %s502_s10 = sphi %s533_s10, %s759_s10   ;;  %s498_s9 = sphi %s531_s9, %s758_s9  }
   0x8   : > { %s556_s15 = sadd.s32 1, %s510_s12   ;;  %s28_s16 = sadd.s32 1, %s506_s11 }
   0x9   : > { %s25_s17 = ssub.s32 %s510_s12, %s556_s15  ;;  %p35_p0 = scmp.ne.s32.totalorder %s506_s11, %s502_s10 }
   0xa   : > { %p26_p1 = scmp.eq.s32.totalorder %s25_s17, 0  ;;  %p36_p2 = scmp.eq.s32.totalorder %s510_s12, 0 }
   0xb   : > { %p41_p3 = scmp.ne.s32.totalorder %s502_s10, %s498_s9  ;;  %p42_p4 = scmp.eq.s32.totalorder %s552_s13, 0 }
   0xc   : > { %s568_s18 = scalar_select %p26_p1, %s506_s11, %s28_s16  }
   0xd   : > { %p570_p5 = por %p36_p2, %p35_p0  ;;  %p574_p6 = por %p42_p4, %p41_p3 }
   0xe   : > { %p91_p7 = scmp.eq.s32.totalorder %s552_s13, 1  ;;  %p97_p8 = scmp.eq.s32.totalorder %s313_s14, 1 }
   0xf   : > { %s746_s20 = scalar_select %p574_p6, 1, 0 }
  0x10   : > { %p345_p10 = scmp.lt.s32.totalorder %s510_s12, 2  ;;  %p581_p11 = por %p91_p7, %p35_p0 }
  0x11   : > { %p585_p12 = por %p97_p8, %p41_p3  ;;  %s590_s23 = sand.u32 1, %s506_s11  }
  0x12   : > { %s747_s21 = scalar_select %p581_p11, 1, 0 }
  0x13   : > { %s748_s22 = scalar_select %p585_p12, 1, 0 }
  0x14   : > { %s317_s24 = sshll.u32 %s510_s12, 7  ;;  %s316_s25 = sshll.u32 %s590_s23, 3 }
  0x15   : > { %s599_s28 = scalar_lea.hbm %s740_s0, %s317_s24  ;;  %s121_s29 = scalar_lea.vmem [#allocation2], %s316_s25 }
  0x16   : > { %s128_s30 = sshll.u32 %s121_s29, 4  ;;  %p605_p13 = pnand %p345_p10, %p570_p5  ;;  %s609_s30 = int_to_ptr.vmem [resolvable:$true] %s128_s30 }
  0x17   : > { %s118_s4 = scalar_lea.sflag [#allocation3], %s590_s23  ;;  %s380_s5 = scalar_lea.hbm %s599_s28, 128 }
  0x18   : > { %p381_p2 = scmp.ne.s32.totalorder %s599_s28, %s380_s5  ;;  %p382_p3 = pneg %p605_p13 }
  0x19   : > { %s385_s8 = scalar_lea.hbm %s740_s0, 256  ;;  %p386_p5 = scmp.lt.u32.totalorder %s599_s28, %s740_s0 }
  0x1a   : > { %p383_p4 = pnand %p382_p3, %p381_p2  ;;  %p387_p8 = scmp.lt.u32.totalorder %s385_s8, %s380_s5 }
  0x1b   : > { %p389_p9 = scmp.lt.u32.totalorder %s380_s5, %s599_s28 }
  0x1c   : > { %p384_p7 = pneg %p383_p4  ;;  %p388_p10 = por %p387_p8, %p386_p5 }
  0x1e   : > { %p390_p0 = por %p389_p9, %p388_p10 }
  0x20   : > { %p391_p1 = pnand %p390_p0, %p384_p7 }
  0x22   : > { %394 = shalt.err (!%p391_p1)
}
  0x23   : > { %s395_s17 = scalar_lea.vmem %s609_s30, 128  ;;  %s512_s19 = smov [#allocation2]  }
  0x24   : > { %p396_p2 = scmp.ne.s32.totalorder %s609_s30, %s395_s17  ;;  %s400_s26 = sshll.u32 %s512_s19, 4  ;;  %s401_s26 = int_to_ptr.vmem [resolvable:$false] %s400_s26 }
  0x25   : > { %s402_s27 = scalar_lea.vmem %s401_s26, 256  ;;  %p403_p11 = scmp.lt.s32.totalorder %s609_s30, %s401_s26 }
  0x26   : > { %p398_p4 = pnand %p396_p2, %p382_p3  ;;  %p404_p5 = scmp.lt.s32.totalorder %s402_s27, %s395_s17 }
  0x28   : > { %p399_p12 = pneg %p398_p4  ;;  %p405_p8 = por %p404_p5, %p403_p11 }
  0x2a   : > { %p406_p9 = pnand %p405_p8, %p399_p12 }
  0x2c   : > { %409 = shalt.err (!%p406_p9)
}
  0x2d   : > { %337 = dma.hbm_to_vmem [thread:$0]  (!%p605_p13), %s599_s28, 128, %s609_s30, %s118_s4  }
  0x2e   : > { %p750_p0 = scmp.lt.s32.totalorder %s510_s12, 3  ;;  %p751_p1 = scmp.ge.s32.totalorder %s510_s12, 1 }
  0x2f   : > { %s652_s7 = scalar_lea.hbm %s741_s1, %s317_s24  ;;  %s139_s8 = scalar_lea.vmem [#allocation5], %s316_s25 }
  0x30   : > { %p643_p7 = pnand %p751_p1, %p750_p0  ;;  %s146_s14 = sshll.u32 %s139_s8, 4  ;;  %s147_s14 = int_to_ptr.vmem [resolvable:$true] %s146_s14 }
  0x31   : > { %s136_s28 = scalar_lea.sflag [#allocation6], %s590_s23  ;;  %s410_s30 = scalar_lea.hbm %s652_s7, 128 }
  0x32   : > { %s752_s29 = scalar_select %p643_p7, 1, 0 }
  0x33   : > { %p411_p11 = scmp.ne.s32.totalorder %s652_s7, %s410_s30  ;;  %s415_s24 = scalar_lea.hbm %s741_s1, 256 }
  0x34   : > { %p416_p2 = scmp.lt.u32.totalorder %s652_s7, %s741_s1  ;;  %p417_p4 = scmp.lt.u32.totalorder %s415_s24, %s410_s30 }
  0x35   : > { %p413_p12 = pnand %p411_p11, %p382_p3  ;;  %p419_p8 = scmp.lt.u32.totalorder %s410_s30, %s652_s7 }
  0x36   : > { %p418_p5 = por %p417_p4, %p416_p2 }
  0x37   : > { %p414_p10 = pneg %p413_p12 }
  0x38   : > { %p420_p9 = por %p419_p8, %p418_p5 }
  0x3a   : > { %p421_p0 = pnand %p420_p9, %p414_p10 }
  0x3c   : > { %424 = shalt.err (!%p421_p0)
}
  0x3d   : > { %s425_s23 = scalar_lea.vmem %s147_s14, 128  ;;  %s513_s25 = smov [#allocation5]  }
  0x3e   : > { %p426_p1 = scmp.ne.s32.totalorder %s147_s14, %s425_s23  ;;  %s430_s26 = sshll.u32 %s513_s25, 4  ;;  %s431_s26 = int_to_ptr.vmem [resolvable:$false] %s430_s26 }
  0x3f   : > { %s432_s27 = scalar_lea.vmem %s431_s26, 256  ;;  %p433_p6 = scmp.lt.s32.totalorder %s147_s14, %s431_s26 }
  0x40   : > { %p428_p11 = pnand %p426_p1, %p382_p3  ;;  %p434_p7 = scmp.lt.s32.totalorder %s432_s27, %s425_s23 }
  0x42   : > { %p429_p12 = pneg %p428_p11  ;;  %p435_p2 = por %p434_p7, %p433_p6 }
  0x44   : > { %p436_p4 = pnand %p435_p2, %p429_p12 }
  0x46   : > { %439 = shalt.err (!%p436_p4)
}
  0x47   : > { %340 = dma.hbm_to_vmem [thread:$0]  (!%p605_p13), %s652_s7, 128, %s147_s14, %s136_s28  }
  0x48   : > { %p753_p10 = scmp.ne.s32.totalorder %s752_s29, 0 }
  0x49   : > { %s679_s5 = sand.u32 (!%p753_p10), 1, %s502_s10   ;;  %p754_p3 = scmp.ne.s32.totalorder (!%p753_p10), %s746_s20, 0 }
  0x4a   : > { %155 = sbr.rel (%p753_p10) target bundleno = 110 (0x6e), region = 28  ;;  %s321_s6 = sshll.u32 (!%p753_p10), %s679_s5, 3 }
  0x4b   : > { %s158_s8 = scalar_lea.sflag (!%p753_p10), [#allocation3], %s679_s5  ;;  %s161_s30 = scalar_lea.vmem (!%p753_p10), [#allocation2], %s321_s6 }
  0x51   : > { %485 = dma.done.wait (%p754_p3), %s158_s8, 128  }
  0x52   : > { %487 = vsyncadd (%p754_p3), %s158_s8, 4294967168  ;;  %s167_s3 = scalar_lea.sflag [#allocation6], %s679_s5  ;;  %s170_s7 = scalar_lea.vmem [#allocation5], %s321_s6 }
  0x53   : > { %489 = dma.done.wait (%p754_p3), %s167_s3, 128  }
  0x54   : > { %491 = vsyncadd (%p754_p3), %s167_s3, 4294967168  ;;  %v196_v0 = vld [vmem:[%s161_s30] sm:$0xff]  ;;  %v197_v1 = vld [vmem:[%s170_s7] sm:$0xff]  ;;  %v514_v4 = vmov 0.2   ;;  %s195_s29 = scalar_lea.vmem [#allocation7], %s321_s6 }
  0x55   : > { %v198_v2 = vsub.f32 %v197_v1, %v196_v0  ;;  %s220_s14 = sshll.u32 %s195_s29, 4  ;;  %s325_s28 = sshll.u32 %s552_s13, 7  ;;  %s693_s14 = int_to_ptr.vmem [resolvable:$true] %s220_s14 }
  0x56   : > { %s698_s16 = scalar_lea.hbm %s742_s2, %s325_s28  ;;  %s207_s24 = scalar_lea.sflag [#allocation4], %s679_s5 }
  0x57   : > { %v199_v3 = vand.u32 2147483647, %v198_v2  ;;  %s440_s17 = scalar_lea.vmem %s693_s14, 128  ;;  %p755_p13 = scmp.ne.s32.totalorder %s747_s21, 0 }
  0x58   : > { %p441_p6 = scmp.ne.s32.totalorder %s693_s14, %s440_s17  ;;  %s515_s13 = smov [#allocation7]  }
  0x59   : > { %vm200_vm0 = vcmp.le.f32.partialorder %v199_v3, 0.001  ;;  %s444_s19 = sshll.u32 %s515_s13, 4  ;;  %s445_s19 = int_to_ptr.vmem [resolvable:$false] %s444_s19 }
  0x5a   : > { %v201_v5 = vsel %vm200_vm0, -0.88, %v514_v4  ;;  %p442_p7 = pnand %p441_p6, %p755_p13  ;;  %s446_s23 = scalar_lea.vmem %s445_s19, 256 }
  0x5b   : > { %v202_v6 = vmul.f32 %v201_v5, %v198_v2  ;;  %p447_p8 = scmp.lt.s32.totalorder %s693_s14, %s445_s19  ;;  %p448_p9 = scmp.lt.s32.totalorder %s446_s23, %s440_s17 }
  0x5c   : > { %p443_p5 = pneg %p442_p7 }
  0x5d   : > { %v203_v7 = vadd.f32 %v202_v6, %v199_v3  ;;  %p449_p0 = por %p448_p9, %p447_p8 }
  0x5f   : > { %205 = vst [vmem:[%s195_s29] sm:$0xff] %v203_v7  ;;  %p450_p1 = pnand %p449_p0, %p443_p5 }
  0x61   : > { %453 = shalt.err (!%p450_p1)
}
  0x62   : > { %s454_s25 = scalar_lea.hbm %s698_s16, 128  ;;  %s458_s5 = scalar_lea.hbm %s742_s2, 256 }
  0x63   : > { %p455_p11 = scmp.ne.s32.totalorder %s698_s16, %s454_s25  ;;  %p459_p4 = scmp.lt.u32.totalorder %s698_s16, %s742_s2 }
  0x64   : > { %p460_p10 = scmp.lt.u32.totalorder %s458_s5, %s454_s25  ;;  %p462_p6 = scmp.lt.u32.totalorder %s454_s25, %s698_s16 }
  0x65   : > { %p456_p12 = pnand %p455_p11, %p755_p13 }
  0x66   : > { %p461_p3 = por %p460_p10, %p459_p4 }
  0x67   : > { %p457_p2 = pneg %p456_p12 }
  0x68   : > { %p463_p7 = por %p462_p6, %p461_p3 }
  0x6a   : > { %p464_p5 = pnand %p463_p7, %p457_p2 }
  0x6c   : > { %467 = shalt.err (!%p464_p5)
}
  0x6d   : > { %332 = dma.vmem_to_hbm [thread:$0]  (%p755_p13), %s693_s14, 128, %s698_s16, %s207_s24  }
  0x6e PF: > { %s232_s30 = sand.u32 1, %s498_s9   ;;  %p756_p8 = scmp.ne.s32.totalorder %s748_s22, 0 }
  0x6f   : > { %p757_p9 = scmp.ge.s32.totalorder %s510_s12, 2  ;;  %s233_s3 = scalar_lea.sflag [#allocation4], %s232_s30 }
  0x71   : > { %p342_p0 = pnand %p757_p9, %p756_p8 }
  0x73   : > { %493 = dma.done.wait (!%p342_p0), %s233_s3, 128  }
  0x74   : > { %495 = vsyncadd (!%p342_p0), %s233_s3, 4294967168  ;;  %p18_p1 = scmp.ge.s32.totalorder %s556_s15, 4   ;;  %s758_s9 = smov %s502_s10 }
  0x75   : > { %s759_s10 = smov %s506_s11  ;;  %s760_s11 = smov %s568_s18 }
  0x76   : > { %s761_s12 = smov %s556_s15  ;;  %20 = sbr.rel (!%p18_p1) target bundleno = 7 (0x7), region = 86 }
  0x7d   :  { %238 = vsyncpa [#allocation3], 1 }
  0x7e   :  { %240 = vsyncpa [#allocation3 + $0x1], 1 }
  0x7f   :  { %241 = vsyncpa [#allocation6], 1 }
  0x80   :  { %243 = vsyncpa [#allocation6 + $0x1], 1 }
  0x81   :  { %244 = vsyncpa [#allocation4], 1 }
  0x82   :  { %246 = vsyncpa [#allocation4 + $0x1], 1 }

</bundles_post_ra>
